<compile_context>
chip_gen: v7x
topology: tpu7x:2x2x1
jax: 0.10.0
libtpu: 0.0.40
codegen_flags: <defaults>
</compile_context>

<pallas_src>
import numpy as np
import jax
import jax.numpy as jnp
from jax import lax
from jax.experimental import pallas as pl
from jax.experimental.pallas import tpu as pltpu


def _fit_log1p_poly(degree=8, npts=2049):
    # Least-squares degree-8 fit of log1p(u) on u in [0, 1] (max err ~1e-6),
    # evaluated with Horner on the VPU when approx_log1p=True.
    u = np.linspace(0.0, 1.0, npts)
    coef_desc = np.polyfit(u, np.log1p(u), degree)
    return tuple(float(v) for v in coef_desc[::-1])      # ascending c0..c8


_LOG1P_POLY_COEFFS = _fit_log1p_poly()


def _make_kernel(blk, w, reps, rows_valid, num_blocks, log1p_coeffs):
    ragged = num_blocks * blk > rows_valid               # static

    def _log1p(u):
        if log1p_coeffs is None:
            return jnp.log1p(u)                           # exact (EUP)
        acc = jnp.full_like(u, log1p_coeffs[-1])          # Horner on the VPU
        for coef in reversed(log1p_coeffs[:-1]):
            acc = acc * u + coef
        return acc

    def _colsum(sp):
        return jnp.sum(sp, axis=0, keepdims=True)[None]   # (1, 1, W)

    def kernel(x_ref, t_ref, bias_ref, cls_ref, expand_ref, out_ref):
        z = x_ref[...].astype(jnp.float32) + bias_ref[...]
        if reps == 1:
            # (blk, 1) target column lane-broadcasts in the comparison below.
            t_lane = t_ref[...]
        else:
            # Expand each sample's target across its C lanes via a tiny MXU
            # matmul with a 0/1 matrix (exact for small integer targets).
            t_lane = jnp.dot(t_ref[...], expand_ref[...],
                             preferred_element_type=jnp.float32)
        # Flip the sign of z at each sample's target lane: softplus(-z) there.
        z = jnp.where(t_lane == cls_ref[...], -z, z)
        sp = jnp.maximum(z, 0.0) + _log1p(jnp.exp(-jnp.abs(z)))

        if not ragged:
            out_ref[...] = _colsum(sp)
        else:
            last = num_blocks - 1
            i = pl.program_id(0)

            @pl.when(i < last)
            def _():
                out_ref[...] = _colsum(sp)

            @pl.when(i == last)
            def _():
                # Mask only the ragged last block (stale/garbage rows -> 0).
                n_valid = rows_valid - last * blk          # static, in (0, blk)
                row = lax.broadcasted_iota(jnp.int32, (blk, w), 0)
                out_ref[...] = _colsum(jnp.where(row < n_valid, sp, 0.0))

    return kernel


def bce_loss_bal(x, target_idx, cls_num, *, block_rows=None, approx_log1p=False):
    """C * BCE_with_logits(x + bal_bias, one_hot(target), reduction='mean')."""
    n, c = x.shape
    itemsize = x.dtype.itemsize

    cls_num = jnp.asarray(cls_num, dtype=jnp.float32)
    pi = cls_num / jnp.sum(cls_num)
    bias = jnp.log(pi) - jnp.log(1.0 - pi)                 # (C,) f32, K = 1.0
    tgt = target_idx.astype(jnp.int32)

    # ---- lane-dense view: each kernel row packs `reps` samples (W = reps*C) ----
    reps_ideal = max(1, 128 // c)
    reps = 1
    for r in range(reps_ideal, 0, -1):
        if n % r == 0:
            reps = r
            break

    if 2 * reps >= reps_ideal:
        # Zero-copy path: (N, C) -> (N//reps, reps*C) is a pure bitcast reshape.
        x_use, tgt_use, n_src = x, tgt, n
    else:
        # No usable divisor of N (e.g. prime batch): pad with < 128//C inert
        # samples whose softplus contribution is exactly 0 (the only path that
        # copies x; aligned batch sizes take the zero-copy path above).
        reps = reps_ideal
        pad_n = (-n) % reps
        pad_rows = jnp.full((pad_n, c), -1e30, dtype=x.dtype)
        pad_rows = pad_rows.at[:, 0].set(1e30)            # target 0 -> flip -> 0
        x_use = jnp.concatenate([x, pad_rows], axis=0)
        tgt_use = jnp.concatenate([tgt, jnp.zeros((pad_n,), jnp.int32)])
        n_src = n + pad_n

    w = reps * c
    rows = n_src // reps
    x2d = x_use.reshape(rows, w)                           # bitcast in zero-copy path
    t2d = tgt_use.astype(jnp.float32).reshape(rows, reps)

    bias_row = jnp.tile(bias, reps).reshape(1, w)          # class pattern repeats
    cls_row = jnp.asarray(np.tile(np.arange(c, dtype=np.float32), reps)).reshape(1, w)
    expand = jnp.asarray(                                  # (reps, W): 1 iff lane//C == j
        (np.repeat(np.arange(reps), c)[None, :] == np.arange(reps)[:, None])
        .astype(np.float32))

    # ---- blocking: >=2 parallel blocks (v7x megacore), ~8 MiB per input buffer ----
    row_bytes = w * itemsize + reps * 4
    if block_rows is None:
        block_rows = (8 * 1024 * 1024) // row_bytes        # ~8 MiB x buffer
    block_rows = min(int(block_rows), (16 * 1024 * 1024) // max(row_bytes, 1))
    block_rows = max(8, (block_rows // 8) * 8)

    if rows <= 8:
        blk, num_blocks = rows, 1                          # full-extent block
    else:
        want_blocks = 4 if rows >= 32 else 2               # let 2 TCs split the grid
        chunk = -(-rows // want_blocks)
        chunk = -(-chunk // 8) * 8
        blk = min(block_rows, chunk)
        num_blocks = -(-rows // blk)

    coeffs = _LOG1P_POLY_COEFFS if approx_log1p else None
    kernel = _make_kernel(blk, w, reps, rows, num_blocks, coeffs)

    partials = pl.pallas_call(
        kernel,
        out_shape=jax.ShapeDtypeStruct((num_blocks, 1, w), jnp.float32),
        grid=(num_blocks,),
        in_specs=[
            pl.BlockSpec((blk, w), lambda i: (i, 0)),        # logits (lane-dense)
            pl.BlockSpec((blk, reps), lambda i: (i, 0)),     # compact targets
            pl.BlockSpec((1, w), lambda i: (0, 0)),          # balanced bias
            pl.BlockSpec((1, w), lambda i: (0, 0)),          # class pattern
            pl.BlockSpec((reps, w), lambda i: (0, 0)),       # lane-expansion matrix
        ],
        out_specs=pl.BlockSpec((1, 1, w), lambda i: (i, 0, 0)),
        compiler_params=pltpu.CompilerParams(
            dimension_semantics=("parallel",),
            vmem_limit_bytes=40 * 1024 * 1024),
        cost_estimate=pl.CostEstimate(
            flops=rows * w * (10 + 2 * reps),
            transcendentals=rows * w * (1 if approx_log1p else 2),
            bytes_accessed=(x2d.size * itemsize + t2d.size * 4
                            + (2 * w + reps * w + num_blocks * w) * 4),
        ),
    )(x2d, t2d, bias_row, cls_row, expand)

    # loss = (1/N) * sum_{n,c} softplus(+-z)
    return jnp.sum(partials) / n


def _reference(x, target_idx, cls_num):
    """Pure-JAX reference mirroring the PyTorch module (sanity check)."""
    n, c = x.shape
    cls_num = jnp.asarray(cls_num, dtype=jnp.float32)
    pi = cls_num / jnp.sum(cls_num)
    bias = jnp.log(pi) - jnp.log(1.0 - pi)
    z = x.astype(jnp.float32) + bias[None, :]
    t = jax.nn.one_hot(target_idx, c, dtype=jnp.float32)
    loss = jnp.maximum(z, 0.0) - z * t + jnp.log1p(jnp.exp(-jnp.abs(z)))
    return c * jnp.mean(loss)


if __name__ == "__main__":
    key = jax.random.PRNGKey(0)

    def run_case(k, n, c, dtype, **kw):
        k1, k2 = jax.random.split(k)
        x = jax.random.normal(k1, (n, c), dtype=jnp.float32).astype(dtype)
        t = jax.random.randint(k2, (n,), 0, c, dtype=jnp.int32)
        cn = jnp.arange(1, c + 1, dtype=jnp.float32) * 5.0
        out = jax.block_until_ready(bce_loss_bal(x, t, cn, **kw))
        ref = jax.block_until_ready(_reference(x, t, cn))
        return out, ref

    ks = jax.random.split(key, 6)

    # 1) C | 128, N a multiple of reps -> single zero-copy (1, 128) row.
    o, r = run_case(ks[0], 8, 16, jnp.float32)
    assert jnp.allclose(o, r, rtol=1e-5, atol=1e-5), (o, r)

    # 2) C = 10 (reps = 10, W = 100): zero-copy, single full-extent block.
    o, r = run_case(ks[1], 50, 10, jnp.float32)
    assert jnp.allclose(o, r, rtol=1e-5, atol=1e-5), (o, r)

    # 3) bf16, multi-block parallel grid with a masked ragged last block.
    o, r = run_case(ks[2], 100, 16, jnp.bfloat16, block_rows=8)
    assert jnp.allclose(o, r, rtol=1e-4, atol=1e-4), (o, r)

    # 4) Prime N with no usable divisor -> minimal inert-sample padding path.
    o, r = run_case(ks[3], 13, 10, jnp.float32)
    assert jnp.allclose(o, r, rtol=1e-5, atol=1e-5), (o, r)

    # 5) C >= 128 (reps == 1, lane dim = C, broadcast-compare path, 2 blocks).
    o, r = run_case(ks[4], 16, 256, jnp.float32)
    assert jnp.allclose(o, r, rtol=1e-5, atol=1e-5), (o, r)

    # 6) VPU polynomial log1p (EUP-pressure knob for v7x / bf16 inputs).
    o, r = run_case(ks[5], 64, 16, jnp.bfloat16, approx_log1p=True)
    assert jnp.allclose(o, r, rtol=1e-3, atol=1e-3), (o, r)

    print("KERNEL_OK")
</pallas_src>

<mosaic_0001>
module attributes {stable_mosaic.version = 11 : i64} {
  func.func @kernel(%arg0: i32, %arg1: memref<1x128xf32, #tpu.memory_space<vmem>>, %arg2: memref<1x8xf32, #tpu.memory_space<vmem>>, %arg3: memref<1x128xf32, #tpu.memory_space<vmem>>, %arg4: memref<1x128xf32, #tpu.memory_space<vmem>>, %arg5: memref<8x128xf32, #tpu.memory_space<vmem>>, %arg6: memref<1x1x128xf32, #tpu.memory_space<vmem>>) attributes {dimension_semantics = [#tpu.dimension_semantics<parallel>], iteration_bounds = array<i64: 1>, scalar_prefetch = 0 : i64, scratch_operands = 0 : i64, tpu.core_type = #tpu.core_type<tc>, window_params = [{transform_indices = @transform_0, window_bounds = array<i64: 1, 128>}, {transform_indices = @transform_1, window_bounds = array<i64: 1, 8>}, {pipeline_mode = #tpu.pipeline_mode<synchronous>, transform_indices = @transform_2, window_bounds = array<i64: 1, 128>}, {pipeline_mode = #tpu.pipeline_mode<synchronous>, transform_indices = @transform_3, window_bounds = array<i64: 1, 128>}, {pipeline_mode = #tpu.pipeline_mode<synchronous>, transform_indices = @transform_4, window_bounds = array<i64: 8, 128>}, {transform_indices = @transform_5, window_bounds = array<i64: 1, 1, 128>}]} {
    %c0 = arith.constant 0 : index
    %c0_0 = arith.constant 0 : index
    %0 = vector.load %arg1[%c0, %c0_0] : memref<1x128xf32, #tpu.memory_space<vmem>>, vector<1x128xf32>
    %c0_1 = arith.constant 0 : index
    %c0_2 = arith.constant 0 : index
    %1 = vector.load %arg3[%c0_1, %c0_2] : memref<1x128xf32, #tpu.memory_space<vmem>>, vector<1x128xf32>
    %2 = arith.addf %0, %1 : vector<1x128xf32>
    %c0_3 = arith.constant 0 : index
    %c0_4 = arith.constant 0 : index
    %3 = vector.load %arg2[%c0_3, %c0_4] : memref<1x8xf32, #tpu.memory_space<vmem>>, vector<1x8xf32>
    %c0_5 = arith.constant 0 : index
    %c0_6 = arith.constant 0 : index
    %4 = vector.load %arg5[%c0_5, %c0_6] : memref<8x128xf32, #tpu.memory_space<vmem>>, vector<8x128xf32>
    %cst = arith.constant dense<0.000000e+00> : vector<1x128xf32>
    %5 = tpu.matmul %3, %4, %cst {dimension_numbers = #tpu.dot_dimension_numbers<[1], [0], [0], [1], [0, 0, 1, 1], [], []>} : vector<1x8xf32>, vector<8x128xf32>, vector<1x128xf32> -> vector<1x128xf32>
    %c0_7 = arith.constant 0 : index
    %c0_8 = arith.constant 0 : index
    %6 = vector.load %arg4[%c0_7, %c0_8] : memref<1x128xf32, #tpu.memory_space<vmem>>, vector<1x128xf32>
    %7 = arith.cmpf oeq, %5, %6 : vector<1x128xf32>
    %cst_9 = arith.constant 0.000000e+00 : f32
    %8 = vector.broadcast %cst_9 : f32 to vector<1x128xf32>
    %9 = arith.subf %8, %2 : vector<1x128xf32>
    %10 = arith.select %7, %9, %2 : vector<1x128xi1>, vector<1x128xf32>
    %cst_10 = arith.constant 0.000000e+00 : f32
    %11 = vector.broadcast %cst_10 : f32 to vector<1x128xf32>
    %12 = arith.maximumf %10, %11 : vector<1x128xf32>
    %13 = math.absf %10 : vector<1x128xf32>
    %cst_11 = arith.constant 0.000000e+00 : f32
    %14 = vector.broadcast %cst_11 : f32 to vector<1x128xf32>
    %15 = arith.subf %14, %13 : vector<1x128xf32>
    %16 = math.exp %15 : vector<1x128xf32>
    %17 = math.log1p %16 : vector<1x128xf32>
    %18 = arith.addf %12, %17 : vector<1x128xf32>
    %cst_12 = arith.constant dense<0.000000e+00> : vector<128xf32>
    %19 = vector.multi_reduction <add>, %18, %cst_12 [0] : vector<1x128xf32> to vector<128xf32>
    %20 = vector.shape_cast %19 : vector<128xf32> to vector<1x128xf32>
    %21 = vector.shape_cast %20 : vector<1x128xf32> to vector<1x1x128xf32>
    %c0_13 = arith.constant 0 : index
    %c0_14 = arith.constant 0 : index
    %c0_15 = arith.constant 0 : index
    %22 = vector.load %arg6[%c0_13, %c0_14, %c0_15] : memref<1x1x128xf32, #tpu.memory_space<vmem>>, vector<1x1x128xf32>
    tpu.vector_store %arg6[%c0_13, %c0_14, %c0_15], %21 {strides = array<i32>} : memref<1x1x128xf32, #tpu.memory_space<vmem>>, vector<1x1x128xf32>,
    return
  }
  func.func @transform_0(%arg0: i32) -> (i32, i32) {
    %c0_i32 = arith.constant 0 : i32
    %c0_i32_0 = arith.constant 0 : i32
    return %arg0, %c0_i32 : i32, i32
  }
  func.func @transform_1(%arg0: i32) -> (i32, i32) {
    %c0_i32 = arith.constant 0 : i32
    %c0_i32_0 = arith.constant 0 : i32
    return %arg0, %c0_i32 : i32, i32
  }
  func.func @transform_2(%arg0: i32) -> (i32, i32) {
    %c0_i32 = arith.constant 0 : i32
    %c0_i32_0 = arith.constant 0 : i32
    %c0_i32_1 = arith.constant 0 : i32
    return %c0_i32, %c0_i32_0 : i32, i32
  }
  func.func @transform_3(%arg0: i32) -> (i32, i32) {
    %c0_i32 = arith.constant 0 : i32
    %c0_i32_0 = arith.constant 0 : i32
    %c0_i32_1 = arith.constant 0 : i32
    return %c0_i32, %c0_i32_0 : i32, i32
  }
  func.func @transform_4(%arg0: i32) -> (i32, i32) {
    %c0_i32 = arith.constant 0 : i32
    %c0_i32_0 = arith.constant 0 : i32
    %c0_i32_1 = arith.constant 0 : i32
    return %c0_i32, %c0_i32_0 : i32, i32
  }
  func.func @transform_5(%arg0: i32) -> (i32, i32, i32) {
    %c0_i32 = arith.constant 0 : i32
    %c0_i32_0 = arith.constant 0 : i32
    %c0_i32_1 = arith.constant 0 : i32
    return %arg0, %c0_i32, %c0_i32_0 : i32, i32, i32
  }
}

</mosaic_0001>

<bundles_post_ra>
// kernel: tpu_custom_call.1
= control target key start
LH: loop header
LB: loop body
LE: loop exit
PB: predicated region body
PF: predicated region fallthrough
CT: control target
= control target key end

     0   :  { %10 = vsyncpa [#allocation3], 0  ;;  %s282_s0 = inlined_call_operand.hbm [shape: f32[1,128], index: 0, kind: input, shape index: {}]   ;;  %s283_s1 = inlined_call_operand.vmem [shape: f32[1,8], index: 1, kind: input, shape index: {}]   ;;  %s284_s2 = inlined_call_operand.vmem [shape: f32[1,128], index: 2, kind: input, shape index: {}]   ;;  %s285_s3 = inlined_call_operand.vmem [shape: f32[1,128], index: 3, kind: input, shape index: {}]   ;;  %s286_s4 = inlined_call_operand.vmem [shape: f32[8,128], index: 4, kind: input, shape index: {}]   ;;  %s287_s5 = inlined_call_operand.hbm [shape: f32[1,1,128], index: 5, kind: output, shape index: {}]  }
   0x1   :  { %11 = vsyncpa [#allocation4], 0  ;;  %s212_s18 = smov [#allocation2]   ;;  %s164_s22 = scalar_lea.hbm %s282_s0, 16 }
   0x2   :  { %s18_s19 = sshll.u32 %s212_s18, 4  ;;  %p165_p0 = scmp.ne.s32.totalorder %s282_s0, %s164_s22  ;;  %s19_s19 = int_to_ptr.vmem [resolvable:$true] %s18_s19 }
   0x3   :  { %p168_p1 = scmp.lt.u32.totalorder %s164_s22, %s282_s0 }
   0x5   :  { %p170_p2 = pnand %p168_p1, %p165_p0 }
   0x7   :  { %173 = shalt.err (!%p170_p2)
}
   0x8   :  { %s174_s27 = scalar_lea.vmem %s19_s19, 16  ;;  %s178_s28 = scalar_lea.vmem %s19_s19, 32 }
   0x9   :  { %p175_p3 = scmp.ne.s32.totalorder %s19_s19, %s174_s27  ;;  %p179_p4 = scmp.lt.s32.totalorder %s19_s19, %s19_s19 }
   0xa   :  { %p180_p5 = scmp.lt.s32.totalorder %s178_s28, %s174_s27 }
   0xc   :  { %p181_p6 = por %p180_p5, %p179_p4 }
   0xe   :  { %p182_p7 = pnand %p181_p6, %p175_p3 }
  0x10   :  { %185 = shalt.err (!%p182_p7)
}
  0x11   :  { %21 = dma.hbm_to_vmem [thread:$0]  %s282_s0, 16, %s19_s19, [#allocation3]  }
  0x12   :  { %208 = dma.done.wait [#allocation3], 16  }
  0x13   :  { %209 = vsyncadd [#allocation3], 4294967280  ;;  %v213_v0 = vmov 0.0   ;;  %vm214_vm0 = vmmov 0   ;;  %vm38_vm1 = vcmask 64512   ;;  %v37_v1 = vld [vmem:[%s286_s4] sm:$0xff] }
  0x14   :  { %151 = vmatprep.subr.mxu0 %v213_v0  ;;  %153 = vmatprep.mubr.msk.f32.mxu0 %vm214_vm0, %v213_v0  ;;  %v36_v2 = vld [vmem:[%s283_s1] sm:$0x1]  ;;  %v33_v3 = vld [vmem:[#allocation2] sm:$0x1]  ;;  %s215_s1 = smov [#allocation5]  }
  0x15   :  { %152 = vmatpush3.msra.mxu0 %v37_v1  ;;  %v34_v4 = vld [vmem:[%s284_s2] sm:$0x1]  ;;  %s139_s2 = sshll.u32 %s215_s1, 4  ;;  %s140_s2 = int_to_ptr.vmem [resolvable:$true] %s139_s2 }
  0x16   :  { %154 = vmatmul.mubr.msk.f32.vlgmr.msra.gmra.mrb[0].mxu0 %vm38_vm1, %v36_v2  ;;  %v35_v5 = vadd.f32 %v34_v4, %v33_v3  ;;  %v112_v6 = vld [vmem:[%s285_s3] sm:$0x1]  ;;  %s186_s3 = scalar_lea.vmem %s140_s2, 16  ;;  %s190_s4 = scalar_lea.vmem %s140_s2, 32 }
  0x17   :  { %p187_p8 = scmp.ne.s32.totalorder %s140_s2, %s186_s3  ;;  %p191_p9 = scmp.lt.s32.totalorder %s140_s2, %s140_s2 }
  0x18   :  { %v114_v7 = vsub.f32 0.0, %v35_v5  ;;  %p192_p10 = scmp.lt.s32.totalorder %s190_s4, %s186_s3 }
  0x1a   :  { %p193_p11 = por %p192_p10, %p191_p9 }
  0x1c   :  { %p194_p12 = pnand %p193_p11, %p187_p8 }
  0xe9   :  { %v108_v8 = vpop.f32.mrb[0].mxu0 }
  0xea   :  { %vm113_vm2 = vcmp.eq.f32.partialorder %v108_v8, %v112_v6  ;;  %v155_v9 = vpop.f32.mrb[1].mxu0 }
  0xeb   :  { %v115_v10 = vsel %vm113_vm2, %v114_v7, %v35_v5 }
  0xec   :  { %v117_v11 = vand.u32 2147483647, %v115_v10  ;;  %v116_v22 = vmax.f32 %v115_v10, 0.0 }
  0xee   :  { %v118_v12 = vsub.f32 0.0, %v117_v11 }
  0xf0   :  { %v119_v13 = vmul.f32 1.442695, %v118_v12 }
  0xf2   :  { %160 = vpow2.f32 %v119_v13 }
  0xfc   :  { %v161_v14 = vpop.eup %160 }
  0xfd   :  { %v121_v15 = vadd.f32 1.0, %v161_v14  ;;  %v124_v16 = vmul.f32 -0.5, %v161_v14  ;;  %v127_v18 = vand.u32 2147483647, %v161_v14 }
  0xff   :  { %162 = vlog2.f32 %v121_v15  ;;  %v125_v17 = vadd.f32 1.0, %v124_v16  ;;  %vm128_vm3 = vcmp.lt.f32.partialorder %v127_v18, 0.0004427343 }
 0x101   :  { %v126_v21 = vmul.f32 %v161_v14, %v125_v17 }
 0x109   :  { %v163_v19 = vpop.eup %162 }
 0x10a   :  { %v123_v20 = vmul.f32 0.6931472, %v163_v19 }
 0x10c   :  { %v129_v23 = vsel %vm128_vm3, %v126_v21, %v123_v20 }
 0x10d   :  { %v130_v24 = vadd.f32 %v129_v23, %v116_v22 }
 0x10f   :  { %132 = vst [vmem:[#allocation5] sm:$0x1] %v130_v24 }
 0x110   :  { %197 = shalt.err (!%p194_p12)
}
 0x111   :  { %s198_s15 = scalar_lea.hbm %s287_s5, 16 }
 0x112   :  { %p199_p13 = scmp.ne.s32.totalorder %s287_s5, %s198_s15  ;;  %p202_p0 = scmp.lt.u32.totalorder %s198_s15, %s287_s5 }
 0x114   :  { %p204_p1 = pnand %p202_p0, %p199_p13 }
 0x116   :  { %207 = shalt.err (!%p204_p1)
}
 0x117   :  { %142 = dma.vmem_to_hbm [thread:$0]  %s140_s2, 16, %s287_s5, [#allocation4]  }
 0x118   :  { %210 = dma.done.wait [#allocation4], 16  }
 0x119   :  { %211 = vsyncadd [#allocation4], 4294967280 }
 0x11a   :  { %146 = vsyncpa [#allocation3], 1 }
 0x11b   :  { %147 = vsyncpa [#allocation4], 1 }

</bundles_post_ra>
